<compile_context>
chip_gen: v7x
topology: tpu7x:2x2x1
jax: 0.10.0
libtpu: 0.0.40
codegen_flags: <defaults>
</compile_context>

<pallas_src>
import jax
import jax.numpy as jnp
from jax import lax
from jax.experimental import pallas as pl
from jax.experimental.pallas import tpu as pltpu


def maml_mlp_kernel(x_ref,
                    w1_ref, b1_ref,
                    w2_ref, b2_ref,
                    w3_ref, b3_ref,
                    w4_ref, b4_ref,
                    o_ref):
    """Fused 4-layer MLP + sigmoid for one batch tile.

    x tile: (TB, D_in) natural layout (features on lanes).
    Activations after layer 1 are kept transposed as (features, TB) so the batch
    sits on the lane axis and the out_dim=1 result is a lane-dense (1, TB) store.
    Weights are PyTorch-layout (out_features, in_features); biases are (out, 1).
    """
    x = x_ref[...]                                             # (TB, D_in)

    # Layer 1: h[h, b] = sum_d W1[h, d] * x[b, d]  -> (H, TB)
    # "NT" dims (contract lhs dim 1 with rhs dim 1) — same pattern as q @ k^T.
    h = lax.dot_general(w1_ref[...], x, (((1,), (1,)), ((), ())),
                        preferred_element_type=jnp.float32)
    h = jnp.maximum(h + b1_ref[...], 0.0)

    def dense(w_ref, b_ref, a):
        # W (out, in) @ a (in, TB) -> (out, TB); f32 accumulation on the MXU.
        y = jnp.dot(w_ref[...], a.astype(w_ref.dtype),
                    preferred_element_type=jnp.float32)
        return y + b_ref[...]

    h = jnp.maximum(dense(w2_ref, b2_ref, h), 0.0)             # (H//4, TB)
    h = jnp.maximum(dense(w3_ref, b3_ref, h), 0.0)             # (H//8, TB)
    z = dense(w4_ref, b4_ref, h)                               # (out_dim, TB)

    o_ref[...] = jax.nn.sigmoid(z).astype(o_ref.dtype)         # lane-dense store


def _choose_batch_tile(B, batch_tile):
    if batch_tile is None:
        if B > 1024:
            return 1024                       # large-batch: >=0.64 MB f32 x-tile DMAs
        if B >= 256 and B % 256 == 0:
            return B // 2                     # 2 parallel steps -> both v7x TCs busy
        return B                              # tiny batch: a single grid step
    batch_tile = int(batch_tile)
    if batch_tile >= B:
        return B
    # Multi-tile blocks must keep the lane axis (output) a multiple of 128.
    batch_tile = 128 * pl.cdiv(batch_tile, 128)
    return B if batch_tile >= B else batch_tile


def maml_forward(x, params, *, batch_tile=None, use_bf16=False):
    """params = (w1, b1, w2, b2, w3, b3, w4, b4); weights (out, in), biases (out, 1)."""
    B, D_in = x.shape
    w1, b1, w2, b2, w3, b3, w4, b4 = params
    out_dim = w4.shape[0]

    compute_dtype = jnp.bfloat16 if use_bf16 else jnp.float32
    itemsize = 2 if use_bf16 else 4
    xk = x.astype(compute_dtype)
    ws = [w.astype(compute_dtype) for w in (w1, w2, w3, w4)]
    bs = [b.astype(jnp.float32) for b in (b1, b2, b3, b4)]     # biases stay f32

    tb = _choose_batch_tile(B, batch_tile)
    num_tiles = pl.cdiv(B, tb)
    b_pad = num_tiles * tb
    if b_pad != B:
        xk = jnp.pad(xk, ((0, b_pad - B), (0, 0)))

    def const_spec(arr):
        nd = arr.ndim
        # Constant block index: Pallas keeps the block resident across grid steps
        # (no per-step re-DMA of the ~21 KB of parameters).
        return pl.BlockSpec(arr.shape, lambda i: (0,) * nd)

    # VMEM budget: double-buffered x/out tiles + params.  Only raise the scoped
    # limit when actually needed; stay far below v7x's 64 MiB physical VMEM.
    w_bytes = sum(int(w.size) * itemsize for w in ws) + sum(int(b.size) * 4 for b in bs)
    vmem_est = 2 * tb * D_in * itemsize + 2 * out_dim * tb * 4 + 2 * w_bytes + (2 << 20)
    cp_kwargs = dict(dimension_semantics=("parallel",))
    if vmem_est > (12 << 20):
        cp_kwargs["vmem_limit_bytes"] = int(min(vmem_est, 48 << 20))

    out_t = pl.pallas_call(
        maml_mlp_kernel,
        out_shape=jax.ShapeDtypeStruct((out_dim, b_pad), jnp.float32),
        grid_spec=pltpu.PrefetchScalarGridSpec(
            num_scalar_prefetch=0,
            grid=(num_tiles,),
            in_specs=[
                pl.BlockSpec((tb, D_in), lambda i: (i, 0)),     # x batch tile
                const_spec(ws[0]), const_spec(bs[0]),
                const_spec(ws[1]), const_spec(bs[1]),
                const_spec(ws[2]), const_spec(bs[2]),
                const_spec(ws[3]), const_spec(bs[3]),
            ],
            # Lane-dense output: (out_dim, batch_tile), batch on the lane axis.
            out_specs=pl.BlockSpec((out_dim, tb), lambda i: (0, i)),
        ),
        compiler_params=pltpu.CompilerParams(**cp_kwargs),
    )(xk, ws[0], bs[0], ws[1], bs[1], ws[2], bs[2], ws[3], bs[3])

    # Tiny layout plumbing back to the PyTorch (B, out_dim) convention.
    return out_t.T[:B]


def init_params(key, input_dim, hidden_dim, output_dim):
    """PyTorch-layout params (same shapes/init scale as MAMLModel's nn.Linear)."""
    dims = [
        (hidden_dim, input_dim),             # l1
        (hidden_dim // 4, hidden_dim),       # l2
        (hidden_dim // 8, hidden_dim // 4),  # l3
        (output_dim, hidden_dim // 8),       # l4
    ]
    params = []
    for dout, din in dims:
        key, kw, kb = jax.random.split(key, 3)
        bound = 1.0 / (din ** 0.5)
        w = jax.random.uniform(kw, (dout, din), jnp.float32, -bound, bound)
        b = jax.random.uniform(kb, (dout, 1), jnp.float32, -bound, bound)
        params += [w, b]
    return tuple(params)


def reference_forward(x, params):
    w1, b1, w2, b2, w3, b3, w4, b4 = params
    h = jax.nn.relu(x @ w1.T + b1[:, 0])
    h = jax.nn.relu(h @ w2.T + b2[:, 0])
    h = jax.nn.relu(h @ w3.T + b3[:, 0])
    return jax.nn.sigmoid(h @ w4.T + b4[:, 0])


if __name__ == "__main__":
    # Shapes consistent with the module: hidden = input_dim // 5, then hidden//4,
    # hidden//8, output_dim = 1.
    input_dim = 160
    hidden_dim = input_dim // 5        # 32
    output_dim = 1

    key = jax.random.PRNGKey(0)
    key, kx = jax.random.split(key)
    params = init_params(key, input_dim, hidden_dim, output_dim)

    # 1) Small batch, f32: whole batch in a single grid step (no tiling overhead).
    x = jax.random.normal(kx, (16, input_dim), jnp.float32)
    out = jax.block_until_ready(maml_forward(x, params))
    ref = reference_forward(x, params)
    assert out.shape == (16, output_dim)
    assert jnp.allclose(out, ref, atol=1e-4, rtol=1e-4), "f32 mismatch vs reference"

    # 2) Larger batch, bf16 compute, explicit 256-row tiles: exercises the
    #    multi-tile + batch-padding + lane-dense-output path.
    key, kx2 = jax.random.split(key)
    xb = jax.random.normal(kx2, (500, input_dim), jnp.float32)
    out_b = jax.block_until_ready(
        maml_forward(xb, params, batch_tile=256, use_bf16=True))
    ref_b = reference_forward(xb, params)
    assert out_b.shape == (500, output_dim)
    assert jnp.allclose(out_b, ref_b, atol=3e-2, rtol=3e-2), "bf16 mismatch vs reference"

    # TODO(synk): dataset loading / MAML inner-outer training loop are host-side
    # logic and intentionally not part of the kernel.
    print("KERNEL_OK")
</pallas_src>

<mosaic_0001>
module attributes {stable_mosaic.version = 11 : i64} {
  func.func @maml_mlp_kernel(%arg0: i32, %arg1: memref<16x160xf32, #tpu.memory_space<vmem>>, %arg2: memref<32x160xf32, #tpu.memory_space<vmem>>, %arg3: memref<32x1xf32, #tpu.memory_space<vmem>>, %arg4: memref<8x32xf32, #tpu.memory_space<vmem>>, %arg5: memref<8x1xf32, #tpu.memory_space<vmem>>, %arg6: memref<4x8xf32, #tpu.memory_space<vmem>>, %arg7: memref<4x1xf32, #tpu.memory_space<vmem>>, %arg8: memref<1x4xf32, #tpu.memory_space<vmem>>, %arg9: memref<1x1xf32, #tpu.memory_space<vmem>>, %arg10: memref<1x16xf32, #tpu.memory_space<vmem>>) attributes {dimension_semantics = [#tpu.dimension_semantics<parallel>], iteration_bounds = array<i64: 1>, scalar_prefetch = 0 : i64, scratch_operands = 0 : i64, tpu.core_type = #tpu.core_type<tc>, window_params = [{transform_indices = @transform_0, window_bounds = array<i64: 16, 160>}, {pipeline_mode = #tpu.pipeline_mode<synchronous>, transform_indices = @transform_1, window_bounds = array<i64: 32, 160>}, {pipeline_mode = #tpu.pipeline_mode<synchronous>, transform_indices = @transform_2, window_bounds = array<i64: 32, 1>}, {pipeline_mode = #tpu.pipeline_mode<synchronous>, transform_indices = @transform_3, window_bounds = array<i64: 8, 32>}, {pipeline_mode = #tpu.pipeline_mode<synchronous>, transform_indices = @transform_4, window_bounds = array<i64: 8, 1>}, {pipeline_mode = #tpu.pipeline_mode<synchronous>, transform_indices = @transform_5, window_bounds = array<i64: 4, 8>}, {pipeline_mode = #tpu.pipeline_mode<synchronous>, transform_indices = @transform_6, window_bounds = array<i64: 4, 1>}, {pipeline_mode = #tpu.pipeline_mode<synchronous>, transform_indices = @transform_7, window_bounds = array<i64: 1, 4>}, {pipeline_mode = #tpu.pipeline_mode<synchronous>, transform_indices = @transform_8, window_bounds = array<i64: 1, 1>}, {transform_indices = @transform_9, window_bounds = array<i64: 1, 16>}]} {
    %c0 = arith.constant 0 : index
    %c0_0 = arith.constant 0 : index
    %0 = vector.load %arg1[%c0, %c0_0] : memref<16x160xf32, #tpu.memory_space<vmem>>, vector<16x160xf32>
    %c0_1 = arith.constant 0 : index
    %c0_2 = arith.constant 0 : index
    %1 = vector.load %arg2[%c0_1, %c0_2] : memref<32x160xf32, #tpu.memory_space<vmem>>, vector<32x160xf32>
    %cst = arith.constant dense<0.000000e+00> : vector<32x16xf32>
    %2 = tpu.matmul %1, %0, %cst {dimension_numbers = #tpu.dot_dimension_numbers<[1], [1], [0], [0], [0, 0, 1, 0], [], []>} : vector<32x160xf32>, vector<16x160xf32>, vector<32x16xf32> -> vector<32x16xf32>
    %c0_3 = arith.constant 0 : index
    %c0_4 = arith.constant 0 : index
    %3 = vector.load %arg3[%c0_3, %c0_4] : memref<32x1xf32, #tpu.memory_space<vmem>>, vector<32x1xf32>
    %4 = vector.broadcast %3 : vector<32x1xf32> to vector<32x16xf32>
    %5 = arith.addf %2, %4 : vector<32x16xf32>
    %cst_5 = arith.constant 0.000000e+00 : f32
    %6 = vector.broadcast %cst_5 : f32 to vector<32x16xf32>
    %7 = arith.maximumf %5, %6 : vector<32x16xf32>
    %c0_6 = arith.constant 0 : index
    %c0_7 = arith.constant 0 : index
    %8 = vector.load %arg4[%c0_6, %c0_7] : memref<8x32xf32, #tpu.memory_space<vmem>>, vector<8x32xf32>
    %cst_8 = arith.constant dense<0.000000e+00> : vector<8x16xf32>
    %9 = tpu.matmul %8, %7, %cst_8 {dimension_numbers = #tpu.dot_dimension_numbers<[1], [0], [0], [1], [0, 0, 1, 1], [], []>} : vector<8x32xf32>, vector<32x16xf32>, vector<8x16xf32> -> vector<8x16xf32>
    %c0_9 = arith.constant 0 : index
    %c0_10 = arith.constant 0 : index
    %10 = vector.load %arg5[%c0_9, %c0_10] : memref<8x1xf32, #tpu.memory_space<vmem>>, vector<8x1xf32>
    %11 = vector.broadcast %10 : vector<8x1xf32> to vector<8x16xf32>
    %12 = arith.addf %9, %11 : vector<8x16xf32>
    %cst_11 = arith.constant 0.000000e+00 : f32
    %13 = vector.broadcast %cst_11 : f32 to vector<8x16xf32>
    %14 = arith.maximumf %12, %13 : vector<8x16xf32>
    %c0_12 = arith.constant 0 : index
    %c0_13 = arith.constant 0 : index
    %15 = vector.load %arg6[%c0_12, %c0_13] : memref<4x8xf32, #tpu.memory_space<vmem>>, vector<4x8xf32>
    %cst_14 = arith.constant dense<0.000000e+00> : vector<4x16xf32>
    %16 = tpu.matmul %15, %14, %cst_14 {dimension_numbers = #tpu.dot_dimension_numbers<[1], [0], [0], [1], [0, 0, 1, 1], [], []>} : vector<4x8xf32>, vector<8x16xf32>, vector<4x16xf32> -> vector<4x16xf32>
    %c0_15 = arith.constant 0 : index
    %c0_16 = arith.constant 0 : index
    %17 = vector.load %arg7[%c0_15, %c0_16] : memref<4x1xf32, #tpu.memory_space<vmem>>, vector<4x1xf32>
    %18 = vector.broadcast %17 : vector<4x1xf32> to vector<4x16xf32>
    %19 = arith.addf %16, %18 : vector<4x16xf32>
    %cst_17 = arith.constant 0.000000e+00 : f32
    %20 = vector.broadcast %cst_17 : f32 to vector<4x16xf32>
    %21 = arith.maximumf %19, %20 : vector<4x16xf32>
    %c0_18 = arith.constant 0 : index
    %c0_19 = arith.constant 0 : index
    %22 = vector.load %arg8[%c0_18, %c0_19] : memref<1x4xf32, #tpu.memory_space<vmem>>, vector<1x4xf32>
    %cst_20 = arith.constant dense<0.000000e+00> : vector<1x16xf32>
    %23 = tpu.matmul %22, %21, %cst_20 {dimension_numbers = #tpu.dot_dimension_numbers<[1], [0], [0], [1], [0, 0, 1, 1], [], []>} : vector<1x4xf32>, vector<4x16xf32>, vector<1x16xf32> -> vector<1x16xf32>
    %c0_21 = arith.constant 0 : index
    %c0_22 = arith.constant 0 : index
    %24 = vector.load %arg9[%c0_21, %c0_22] : memref<1x1xf32, #tpu.memory_space<vmem>>, vector<1x1xf32>
    %25 = vector.broadcast %24 : vector<1x1xf32> to vector<1x16xf32>
    %26 = arith.addf %23, %25 : vector<1x16xf32>
    %27 = arith.negf %26 : vector<1x16xf32>
    %28 = math.exp %27 : vector<1x16xf32>
    %cst_23 = arith.constant 1.000000e+00 : f32
    %29 = vector.broadcast %cst_23 : f32 to vector<1x16xf32>
    %30 = arith.addf %29, %28 : vector<1x16xf32>
    %31 = arith.divf %29, %30 : vector<1x16xf32>
    %c0_24 = arith.constant 0 : index
    %c0_25 = arith.constant 0 : index
    %32 = vector.load %arg10[%c0_24, %c0_25] : memref<1x16xf32, #tpu.memory_space<vmem>>, vector<1x16xf32>
    tpu.vector_store %arg10[%c0_24, %c0_25], %31 {strides = array<i32>} : memref<1x16xf32, #tpu.memory_space<vmem>>, vector<1x16xf32>,
    return
  }
  func.func @transform_0(%arg0: i32) -> (i32, i32) {
    %c0_i32 = arith.constant 0 : i32
    %c0_i32_0 = arith.constant 0 : i32
    return %arg0, %c0_i32 : i32, i32
  }
  func.func @transform_1(%arg0: i32) -> (i32, i32) {
    %c0_i32 = arith.constant 0 : i32
    %c0_i32_0 = arith.constant 0 : i32
    %c0_i32_1 = arith.constant 0 : i32
    return %c0_i32, %c0_i32_0 : i32, i32
  }
  func.func @transform_2(%arg0: i32) -> (i32, i32) {
    %c0_i32 = arith.constant 0 : i32
    %c0_i32_0 = arith.constant 0 : i32
    %c0_i32_1 = arith.constant 0 : i32
    return %c0_i32, %c0_i32_0 : i32, i32
  }
  func.func @transform_3(%arg0: i32) -> (i32, i32) {
    %c0_i32 = arith.constant 0 : i32
    %c0_i32_0 = arith.constant 0 : i32
    %c0_i32_1 = arith.constant 0 : i32
    return %c0_i32, %c0_i32_0 : i32, i32
  }
  func.func @transform_4(%arg0: i32) -> (i32, i32) {
    %c0_i32 = arith.constant 0 : i32
    %c0_i32_0 = arith.constant 0 : i32
    %c0_i32_1 = arith.constant 0 : i32
    return %c0_i32, %c0_i32_0 : i32, i32
  }
  func.func @transform_5(%arg0: i32) -> (i32, i32) {
    %c0_i32 = arith.constant 0 : i32
    %c0_i32_0 = arith.constant 0 : i32
    %c0_i32_1 = arith.constant 0 : i32
    return %c0_i32, %c0_i32_0 : i32, i32
  }
  func.func @transform_6(%arg0: i32) -> (i32, i32) {
    %c0_i32 = arith.constant 0 : i32
    %c0_i32_0 = arith.constant 0 : i32
    %c0_i32_1 = arith.constant 0 : i32
    return %c0_i32, %c0_i32_0 : i32, i32
  }
  func.func @transform_7(%arg0: i32) -> (i32, i32) {
    %c0_i32 = arith.constant 0 : i32
    %c0_i32_0 = arith.constant 0 : i32
    %c0_i32_1 = arith.constant 0 : i32
    return %c0_i32, %c0_i32_0 : i32, i32
  }
  func.func @transform_8(%arg0: i32) -> (i32, i32) {
    %c0_i32 = arith.constant 0 : i32
    %c0_i32_0 = arith.constant 0 : i32
    %c0_i32_1 = arith.constant 0 : i32
    return %c0_i32, %c0_i32_0 : i32, i32
  }
  func.func @transform_9(%arg0: i32) -> (i32, i32) {
    %c0_i32 = arith.constant 0 : i32
    %c0_i32_0 = arith.constant 0 : i32
    return %c0_i32, %arg0 : i32, i32
  }
}

</mosaic_0001>

<bundles_post_ra>
// kernel: tpu_custom_call.1
= control target key start
LH: loop header
LB: loop body
LE: loop exit
PB: predicated region body
PF: predicated region fallthrough
CT: control target
= control target key end

     0   :  { %s716_s0 = inlined_call_operand.vmem [shape: f32[16,160], index: 0, kind: input, shape index: {}]   ;;  %s717_s1 = inlined_call_operand.hbm [shape: f32[32,160], index: 1, kind: input, shape index: {}]   ;;  %s718_s2 = inlined_call_operand.vmem [shape: f32[32,1], index: 2, kind: input, shape index: {}]   ;;  %s719_s3 = inlined_call_operand.vmem [shape: f32[8,32], index: 3, kind: input, shape index: {}]   ;;  %s720_s4 = inlined_call_operand.vmem [shape: f32[8,1], index: 4, kind: input, shape index: {}]   ;;  %s721_s5 = inlined_call_operand.vmem [shape: f32[4,8], index: 5, kind: input, shape index: {}]   ;;  %s722_s6 = inlined_call_operand.vmem [shape: f32[4,1], index: 6, kind: input, shape index: {}]   ;;  %s723_s7 = inlined_call_operand.vmem [shape: f32[1,4], index: 7, kind: input, shape index: {}]   ;;  %s724_s8 = inlined_call_operand.<no memory space> [shape: f32[1,1], index: 8, kind: input, shape index: {}]   ;;  %s725_s9 = inlined_call_operand.hbm [shape: f32[1,16], index: 9, kind: output, shape index: {}]  }
   0x1   :  { %v14_v0 = vstv %s724_s8 }
   0x2   :  { %15 = vst [vmem:[#allocation2] sm:$0x1] %v14_v0 }
   0x3   :  { %16 = vsyncpa [#allocation4], 0 }
   0x4   :  { %17 = vsyncpa [#allocation5], 0  ;;  %s582_s11 = smov [#allocation3]   ;;  %s534_s15 = scalar_lea.hbm %s717_s1, 1024 }
   0x5   :  { %s25_s12 = sshll.u32 %s582_s11, 4  ;;  %p535_p0 = scmp.ne.s32.totalorder %s717_s1, %s534_s15  ;;  %s26_s12 = int_to_ptr.vmem [resolvable:$true] %s25_s12 }
   0x6   :  { %p538_p1 = scmp.lt.u32.totalorder %s534_s15, %s717_s1 }
   0x8   :  { %p540_p2 = pnand %p538_p1, %p535_p0 }
   0xa   :  { %543 = shalt.err (!%p540_p2)
}
   0xb   :  { %s544_s8 = scalar_lea.vmem %s26_s12, 1024  ;;  %p549_p4 = scmp.lt.s32.totalorder %s26_s12, %s26_s12 }
   0xc   :  { %p545_p3 = scmp.ne.s32.totalorder %s26_s12, %s544_s8  ;;  %p550_p5 = scmp.lt.s32.totalorder %s544_s8, %s544_s8 }
   0xe   :  { %p551_p6 = por %p550_p5, %p549_p4 }
  0x10   :  { %p552_p7 = pnand %p551_p6, %p545_p3 }
  0x12   :  { %555 = shalt.err (!%p552_p7)
}
  0x13   :  { %s583_s20 = smov 256   ;;  %s584_s21 = smov 16  }
  0x14   :  { %31 = dma.hbm_to_vmem [thread:$0]  %s717_s1, 1024, %s26_s12, [#allocation4], %s583_s20, %s583_s20, %s584_s21  }
  0x15   :  { %578 = dma.done.wait [#allocation4], 1024  }
  0x16   :  { %579 = vsyncadd [#allocation4], 4294966272  ;;  %v585_v1 = vmov 0   ;;  %vm85_vm0 = vcmask 261120   ;;  %v50_v2 = vld [vmem:[%s716_s0 + $0x8] sm:$0xff]  ;;  %v52_v3 = vld [vmem:[%s716_s0 + $0x18] sm:$0xff]  ;;  %v363_v60 = vlaneseq }
  0x17   :  { %528 = vset.pattern.permute.xlu0 %v585_v1  ;;  %529 = vset.pattern.permute.xlu1 %v585_v1  ;;  %vm510_vm1 = vmpackc.low %vm85_vm0, %vm85_vm0  ;;  %v49_v4 = vld [vmem:[%s716_s0] sm:$0xff]  ;;  %v509_v5 = vpack.c.bf16 %v52_v3, %v50_v2  ;;  %v51_v6 = vld [vmem:[%s716_s0 + $0x10] sm:$0xff]  ;;  %v586_v23 = vmov 0.0|0.0   ;;  %vm587_vm2 = vmmov 0   ;;  %v588_v24 = vmov 0.0  }
  0x18   :  { %v54_v7 = vld [vmem:[#allocation3 + $0x8] sm:$0xff]  ;;  %v512_v8 = vpack.c.bf16 %v51_v6, %v49_v4  ;;  %v61_v9 = vld [vmem:[%s718_s2] sm:$0xff]  ;;  %v64_v12 = vld [vmem:[%s718_s2 + $0x18] sm:$0xff]  ;;  %514 = vmatprep.subr.bf16.mxu1 %v586_v23  ;;  %496 = vmatprep.mubr.msk.f32.mxu1 %vm587_vm2, %v588_v24  ;;  %vm281_vm3 = vcmask 64512   ;;  %vm371_vm4 = vcmask 1043456   ;;  %vm367_vm5 = vcmask 31744  }
  0x19   :  { %470 = vmatprep.mubr.msk.f32.mxu0 %vm85_vm0, %v54_v7  ;;  %511 = vmatprep.subr.msk.bf16.mxu0 %vm510_vm1, %v509_v5  ;;  %v63_v10 = vld [vmem:[%s718_s2 + $0x10] sm:$0xff]  ;;  %v62_v11 = vld [vmem:[%s718_s2 + $0x8] sm:$0xff]  ;;  %v56_v14 = vld [vmem:[#allocation3 + $0x18] sm:$0xff]  ;;  %v364_v61 = vshrl.u32 %v363_v60, 7  ;;  %vm451_vm6 = vcmask 122880  }
  0x1a   :  { %513 = vmatpush1.bf16.xpose.msra.mxu0 %v512_v8  ;;  %67 = vperm.xlu0 %528, %v61_v9   ;;  %v53_v13 = vld [vmem:[#allocation3] sm:$0xff]  ;;  %v55_v17 = vld [vmem:[#allocation3 + $0x10] sm:$0xff]  ;;  %v58_v18 = vld [vmem:[#allocation3 + $0x28] sm:$0xff] }
  0x1b   :  { %77 = vperm.xlu1 %529, %v63_v10   ;;  %v194_v15 = vld [vmem:[%s720_s4] sm:$0xff]  ;;  %v59_v22 = vld [vmem:[#allocation3 + $0x30] sm:$0xff]  ;;  %v365_v62 = vsub.s32 0, %v364_v61 }
  0x1c   :  { %v275_v16 = vld [vmem:[%s722_s6] sm:$0xf] }
  0x1d   :  { %v357_v19 = vld [vmem:[#allocation2] sm:$0x1]  ;;  %v57_v20 = vld [vmem:[#allocation3 + $0x20] sm:$0xff] }
  0x1e   :  { %72 = vperm.xlu0 %528, %v62_v11   ;;  %v60_v21 = vld [vmem:[#allocation3 + $0x38] sm:$0xff] }
  0x1f   :  { %82 = vperm.xlu1 %529, %v64_v12   ;;  %v193_v47 = vld [vmem:[%s719_s3] sm:$0xff] }
  0x20   :  { %v274_v53 = vld [vmem:[%s721_s5] sm:$0xf]  ;;  %s589_s5 = smov [#allocation6]  }
  0x21   :  { %169 = vmatmul.mubr.f32.vlgmr.msra.gmra.mrb[0].mxu0 %v53_v13  ;;  %v356_v59 = vld [vmem:[%s723_s7] sm:$0x1]  ;;  %s459_s22 = sshll.u32 %s589_s5, 4  ;;  %s460_s22 = int_to_ptr.vmem [resolvable:$true] %s459_s22 }
  0x22   :  { %471 = vmatprep.mubr.msk.f32.mxu0 %vm85_vm0, %v56_v14  ;;  %197 = vperm.xlu0 %528, %v194_v15   ;;  %s556_s7 = scalar_lea.vmem %s460_s22, 16  ;;  %s560_s23 = scalar_lea.vmem %s460_s22, 32 }
  0x23   :  { %278 = vperm.xlu1 %529, %v275_v16   ;;  %p557_p8 = scmp.ne.s32.totalorder %s460_s22, %s556_s7  ;;  %p561_p9 = scmp.lt.s32.totalorder %s460_s22, %s460_s22 }
  0x24   :  { %p562_p10 = scmp.lt.s32.totalorder %s560_s23, %s556_s7 }
  0x25   :  { %174 = vmatmul.mubr.f32.gmra.mrb[2].mxu0 %v55_v17 }
  0x26   :  { %472 = vmatprep.mubr.msk.f32.mxu0 %vm85_vm0, %v58_v18  ;;  %360 = vperm.xlu0 %528, %v357_v19   ;;  %p563_p11 = por %p562_p10, %p561_p9 }
  0x28   :  { %p564_p12 = pnand %p563_p11, %p557_p8 }
  0x29   :  { %179 = vmatmul.mubr.f32.gmra.mrb[4].mxu0 %v57_v20 }
  0x2a   :  { %473 = vmatprep.mubr.msk.f32.mxu0 %vm85_vm0, %v60_v21 }
  0x2d   :  { %184 = vmatmul.mubr.f32.gmra.mrb[6].mxu0 %v59_v22 }
  0x99   :  { %v68_v25 = vpop.permute.xlu0 %67 }
  0x9a   :  { %v78_v33 = vpop.permute.xlu1 %77 }
  0x9d   :  { %v73_v29 = vpop.permute.xlu0 %72 }
  0x9e   :  { %v83_v40 = vpop.permute.xlu1 %82 }
  0xa1   :  { %v198_v48 = vpop.permute.xlu0 %197 }
  0xa2   :  { %v279_v54 = vpop.permute.xlu1 %278 }
  0xa5   :  { %v361_v63 = vpop.permute.xlu0 %360 }
  0xa6   :  { %v366_v0 = vrot.slane %v361_v63, %v365_v62 }
  0xf4   :  { %v170_v26 = vpop.f32.mrb[0].mxu0 }
  0xf5   :  { %v172_v27 = vpop.f32.mrb[1].mxu0  ;;  %v171_v28 = vadd.f32 %v170_v26, %v68_v25 }
  0xf7   :  { %v189_v34 = vmax.f32 %v171_v28, 0.0 }
  0xf8   :  { %v175_v30 = vpop.f32.mrb[2].mxu0 }
  0xf9   :  { %v176_v31 = vadd.f32 %v175_v30, %v73_v29  ;;  %v177_v32 = vpop.f32.mrb[3].mxu0 }
  0xfb   :  { %v190_v35 = vmax.f32 %v176_v31, 0.0 }
  0xfc   :  { %v180_v36 = vpop.f32.mrb[4].mxu0 }
  0xfd   :  { %v182_v37 = vpop.f32.mrb[5].mxu0  ;;  %v515_v38 = vpack.c.bf16 %v190_v35, %v189_v34  ;;  %v181_v39 = vadd.f32 %v180_v36, %v78_v33 }
  0xff   :  { %516 = vmatpush3.bf16.msra.mxu1 %v515_v38  ;;  %v191_v44 = vmax.f32 %v181_v39, 0.0 }
 0x100   :  { %v185_v41 = vpop.f32.mrb[6].mxu0  ;;  %517 = vmatprep.subr.bf16.mxu1 %v586_v23 }
 0x101   :  { %v186_v42 = vadd.f32 %v185_v41, %v83_v40  ;;  %v187_v43 = vpop.f32.mrb[7].mxu0 }
 0x103   :  { %v192_v45 = vmax.f32 %v186_v42, 0.0 }
 0x105   :  { %v518_v46 = vpack.c.bf16 %v192_v45, %v191_v44 }
 0x107   :  { %519 = vmatpush3.bf16.msra.mxu1 %v518_v46 }
 0x108   :  { %499 = vmatprep.subr.mxu1 %v588_v24 }
 0x10a   :  { %497 = vmatmul.mubr.msk.f32.vlgmr.msra.gmra.mrb[0].mxu1 %vm85_vm0, %v193_v47 }
 0x10b   :  { %501 = vmatprep.mubr.msk.f32.mxu1 %vm587_vm2, %v588_v24 }
 0x1dd   :  { %v269_v49 = vpop.f32.mrb[0].mxu1 }
 0x1de   :  { %v270_v50 = vadd.f32 %v269_v49, %v198_v48  ;;  %v498_v51 = vpop.f32.mrb[1].mxu1 }
 0x1e0   :  { %v273_v52 = vmax.f32 %v270_v50, 0.0 }
 0x1e2   :  { %500 = vmatpush3.msra.mxu1 %v273_v52 }
 0x1e3   :  { %502 = vmatmul.mubr.msk.f32.vlgmr.msra.gmra.mrb[2].mxu1 %vm281_vm3, %v274_v53  ;;  %504 = vmatprep.subr.mxu1 %v588_v24 }
 0x1e4   :  { %506 = vmatprep.mubr.msk.f32.mxu1 %vm587_vm2, %v588_v24 }
 0x2b6   :  { %v351_v55 = vpop.f32.mrb[2].mxu1 }
 0x2b7   :  { %v352_v56 = vadd.f32 %v351_v55, %v279_v54  ;;  %v503_v57 = vpop.f32.mrb[3].mxu1 }
 0x2b9   :  { %v355_v58 = vmax.f32 %v352_v56, 0.0 }
 0x2bb   :  { %505 = vmatpush3.msk.msra.mxu1 %vm371_vm4, %v355_v58 }
 0x2bc   :  { %507 = vmatmul.mubr.msk.f32.vlgmr.msra.gmra.mrb[4].mxu1 %vm367_vm5, %v356_v59 }
 0x38f   :  { %v441_v1 = vpop.f32.mrb[4].mxu1 }
 0x390   :  { %v442_v2 = vadd.f32 %v441_v1, %v366_v0  ;;  %v508_v3 = vpop.f32.mrb[5].mxu1 }
 0x392   :  { %v478_v4 = vmul.f32 -1.442695, %v442_v2 }
 0x394   :  { %530 = vpow2.f32 %v478_v4 }
 0x39e   :  { %v531_v5 = vpop.eup %530 }
 0x39f   :  { %v448_v6 = vadd.f32 1.0, %v531_v5 }
 0x3a1   :  { %532 = vrcp.f32 %v448_v6 }
 0x3ab   :  { %v533_v7 = vpop.eup %532 }
 0x3ac   :  { %452 = vst.msk [vmem:[#allocation6] sm:$0x1] %vm451_vm6, %v533_v7 }
 0x3ad   :  { %567 = shalt.err (!%p564_p12)
}
 0x3ae   :  { %s568_s26 = scalar_lea.hbm %s725_s9, 16 }
 0x3af   :  { %p569_p13 = scmp.ne.s32.totalorder %s725_s9, %s568_s26  ;;  %p572_p0 = scmp.lt.u32.totalorder %s568_s26, %s725_s9 }
 0x3b1   :  { %p574_p1 = pnand %p572_p0, %p569_p13 }
 0x3b3   :  { %577 = shalt.err (!%p574_p1)
}
 0x3b4   :  { %462 = dma.vmem_to_hbm [thread:$0]  %s460_s22, 16, %s725_s9, [#allocation5]  }
 0x3b5   :  { %580 = dma.done.wait [#allocation5], 16  }
 0x3b6   :  { %581 = vsyncadd [#allocation5], 4294967280 }
 0x3b7   :  { %466 = vsyncpa [#allocation4], 1 }
 0x3b8   :  { %467 = vsyncpa [#allocation5], 1 }

</bundles_post_ra>
